<compile_context>
chip_gen: v6e
topology: v6e:2x2x1
jax: 0.10.0
libtpu: 0.0.40
codegen_flags: <defaults>
</compile_context>

<pallas_src>
import math
from functools import partial

import jax
import jax.numpy as jnp
from jax.experimental import pallas as pl
from jax.experimental.pallas import tpu as pltpu

_INV_SQRT2 = 1.0 / math.sqrt(2.0)


def _round_up(n, m):
    return ((n + m - 1) // m) * m


def _pad_to(a, shape):
    """Zero-pad `a` up to `shape`; no-op (no copy) if already that shape."""
    if tuple(a.shape) == tuple(shape):
        return a
    return jnp.pad(a, [(0, t - s) for s, t in zip(a.shape, shape)])


def _vmem_limit_bytes():
    cap = 128 * 1024 * 1024
    try:
        info = pltpu.get_tpu_info()
        cap = int(getattr(info, "vmem_capacity_bytes", cap))
    except Exception:
        pass
    # 64 MiB on 128-MiB parts (v5e/v6e), 48 MiB on v7x (64 MiB physical).
    return min(64 * 1024 * 1024, (cap * 3) // 4)


def _residual_block_kernel(dilation, need_edge_masks, compute_dtype,
                           x_ref, dp_ref, cond_ref, mask_ref,
                           wfused_ref, wo_ref, bdc_ref, bo_ref,
                           out_ref, skip_ref):
    Cp = x_ref.shape[1]
    Lp = x_ref.shape[2]
    d = dilation

    x = x_ref[0]                                    # (Cp, Lp) f32
    mask = mask_ref[0]                              # (1, Lp)  f32
    # Masked conv input; cast to compute_dtype BEFORE the rolls so XLU and
    # concat traffic is half-width in the bf16 production config.
    z = ((x + dp_ref[0]) * mask).astype(compute_dtype)          # (Cp, Lp)

    # Dilated conv (k=3, padding=d, dilation=d) + 1x1 conditioner conv as ONE
    # fused MXU matmul: stack [z(t-d); z(t); z(t+d); cond] along sublanes.
    z_prev = pltpu.roll(z, shift=d, axis=1)
    z_next = pltpu.roll(z, shift=Lp - d, axis=1)
    if need_edge_masks:
        # Only needed when the zero tail is shorter than the dilation.
        lane = jax.lax.broadcasted_iota(jnp.int32, (Cp, Lp), 1)
        zero = jnp.zeros((), compute_dtype)
        z_prev = jnp.where(lane >= d, z_prev, zero)
        z_next = jnp.where(lane < Lp - d, z_next, zero)

    stacked = jnp.concatenate([z_prev, z, z_next, cond_ref[0]], axis=0)  # (3Cp+Mp, Lp)

    y2 = jnp.dot(wfused_ref[...], stacked,
                 preferred_element_type=jnp.float32)            # (2Cp, Lp) f32
    y2 = y2 + bdc_ref[...]          # folded (dilated-conv + conditioner) bias

    # Gated activation in f32 (v5e-safe).
    # TODO(synk): optionally run gating in bf16 on v6e/v7x (bf16 EUP) if the
    # EUP slot ever becomes the binding unit.
    act = jax.nn.sigmoid(y2[:Cp]) * jnp.tanh(y2[Cp:])           # (Cp, Lp) f32

    out = jnp.dot(wo_ref[...], (act * mask).astype(compute_dtype),
                  preferred_element_type=jnp.float32) + bo_ref[...]  # (2Cp, Lp)

    out_ref[0] = ((x + out[:Cp]) * _INV_SQRT2).astype(out_ref.dtype)
    skip_ref[0] = out[Cp:].astype(skip_ref.dtype)


@partial(jax.jit, static_argnames=("dilation", "compute_dtype", "skip_dtype"))
def residual_block(x, diffusion_step, conditioner, x_mask, params, dilation,
                   compute_dtype=jnp.bfloat16, skip_dtype=None):
    B, C, L = x.shape
    n_mels = conditioner.shape[1]
    d = int(dilation)
    f32 = jnp.float32
    skip_dtype = compute_dtype if skip_dtype is None else skip_dtype

    # Sublane alignment: 16 for 2-byte compute dtypes, 8 for f32.
    sub = 8 * max(1, 4 // jnp.dtype(compute_dtype).itemsize)
    Cp = _round_up(C, sub)
    Mp = _round_up(n_mels, sub)
    Lp = _round_up(L, 128)
    assert 1 <= d < Lp, "dilation must be in [1, padded time axis)"
    # If the 128-lane padding already provides >= d zero lanes, the kernel can
    # skip the roll edge masks entirely.
    need_edge_masks = Lp < L + d

    # --- hoisted diffusion Linear: one batched XLA matmul -> (B, Cp, 1)
    dp = (diffusion_step.astype(f32) @ params["wlin"].T.astype(f32)
          + params["blin"].astype(f32))                          # (B, C)
    dp_p = _pad_to(dp[:, :, None], (B, Cp, 1))

    # --- activations: pad / cast only when actually needed (aligned prod
    #     shapes go straight through with zero extra HBM traffic)
    x_needs_copy = (x.dtype != f32) or (C != Cp) or (L != Lp)
    x_p = _pad_to(x.astype(f32), (B, Cp, Lp)) if x_needs_copy else x
    mask_p = _pad_to(jnp.broadcast_to(x_mask.astype(f32), (B, 1, L)), (B, 1, Lp))
    cond_p = _pad_to(conditioner.astype(compute_dtype), (B, Mp, Lp))

    # --- weights: pad gate/filter halves separately so chunks stay at
    #     [0:Cp] / [Cp:2Cp] inside the kernel
    def pad_out_channels(w):                       # (2C, K) -> (2Cp, K)
        wp = jnp.zeros((2 * Cp, w.shape[1]), w.dtype)
        return wp.at[:C].set(w[:C]).at[Cp:Cp + C].set(w[C:])

    wd = params["wd"].astype(f32)                  # (2C, C, 3)
    wc = params["wc"][:, :, 0].astype(f32)         # (2C, n_mels)
    wfused = jnp.concatenate(
        [_pad_to(wd[:, :, k], (2 * C, Cp)) for k in range(3)]
        + [_pad_to(wc, (2 * C, Mp))], axis=1)                    # (2C, 3Cp+Mp)
    wfused_p = pad_out_channels(wfused).astype(compute_dtype)    # (2Cp, 3Cp+Mp)
    wo_p = pad_out_channels(
        _pad_to(params["wo"][:, :, 0].astype(f32), (2 * C, Cp))
    ).astype(compute_dtype)                                      # (2Cp, Cp)
    bdc_p = pad_out_channels((params["bd"].astype(f32)
                              + params["bc"].astype(f32))[:, None])  # (2Cp, 1)
    bo_p = pad_out_channels(params["bo"].astype(f32)[:, None])       # (2Cp, 1)

    K = 3 * Cp + Mp
    grid_spec = pltpu.PrefetchScalarGridSpec(
        num_scalar_prefetch=0,
        grid=(B,),
        in_specs=[
            pl.BlockSpec((1, Cp, Lp), lambda b: (b, 0, 0)),     # x (f32)
            pl.BlockSpec((1, Cp, 1), lambda b: (b, 0, 0)),      # diffusion projection
            pl.BlockSpec((1, Mp, Lp), lambda b: (b, 0, 0)),     # conditioner (compute_dtype)
            pl.BlockSpec((1, 1, Lp), lambda b: (b, 0, 0)),      # mask
            pl.BlockSpec((2 * Cp, K), lambda b: (0, 0)),        # fused [conv taps | cond] W
            pl.BlockSpec((2 * Cp, Cp), lambda b: (0, 0)),       # output W
            pl.BlockSpec((2 * Cp, 1), lambda b: (0, 0)),        # folded bias (bd + bc)
            pl.BlockSpec((2 * Cp, 1), lambda b: (0, 0)),        # output bias
        ],
        out_specs=[
            pl.BlockSpec((1, Cp, Lp), lambda b: (b, 0, 0)),     # (x + residual)/sqrt(2), f32
            pl.BlockSpec((1, Cp, Lp), lambda b: (b, 0, 0)),     # skip, skip_dtype
        ],
    )

    out_p, skip_p = pl.pallas_call(
        partial(_residual_block_kernel, d, need_edge_masks, compute_dtype),
        out_shape=(jax.ShapeDtypeStruct((B, Cp, Lp), f32),
                   jax.ShapeDtypeStruct((B, Cp, Lp), skip_dtype)),
        grid_spec=grid_spec,
        compiler_params=pltpu.CompilerParams(
            dimension_semantics=("parallel",),
            vmem_limit_bytes=_vmem_limit_bytes(),
        ),
        # Reuse x's HBM buffer for the residual output only when x_p is a
        # fresh padded copy (never clobber the caller's x).
        input_output_aliases={0: 0} if x_needs_copy else {},
    )(x_p, dp_p, cond_p, mask_p, wfused_p, wo_p, bdc_p, bo_p)

    return out_p[:, :C, :L], skip_p[:, :C, :L]


def residual_block_ref(x, diffusion_step, conditioner, x_mask, params, dilation):
    """Pure-JAX reference matching the PyTorch forward semantics."""
    B, C, L = x.shape
    d = dilation
    dp = diffusion_step @ params["wlin"].T + params["blin"]         # (B, C)
    y = x + dp[:, :, None]
    z = y * x_mask
    zpad = jnp.pad(z, ((0, 0), (0, 0), (d, d)))
    conv = jnp.broadcast_to(params["bd"][None, :, None], (B, 2 * C, L))
    for k in range(3):
        conv = conv + jnp.einsum("oc,bcl->bol",
                                 params["wd"][:, :, k], zpad[:, :, k * d:k * d + L])
    cond = jnp.einsum("om,bml->bol", params["wc"][:, :, 0], conditioner) \
        + params["bc"][None, :, None]
    y2 = conv + cond
    gate, filt = y2[:, :C], y2[:, C:]
    act = jax.nn.sigmoid(gate) * jnp.tanh(filt)
    out = jnp.einsum("oc,bcl->bol", params["wo"][:, :, 0], act * x_mask) \
        + params["bo"][None, :, None]
    residual, skip = out[:, :C], out[:, C:]
    return (x + residual) / math.sqrt(2.0), skip


def init_params(key, n_mels, C, dim_base):
    ks = jax.random.split(key, 8)
    lin_bound = 1.0 / math.sqrt(dim_base)
    wlin = jax.random.uniform(ks[0], (C, dim_base), jnp.float32, -lin_bound, lin_bound)
    blin = jax.random.uniform(ks[1], (C,), jnp.float32, -lin_bound, lin_bound)
    wd = jax.random.normal(ks[2], (2 * C, C, 3), jnp.float32) * math.sqrt(2.0 / (C * 3))
    bd = jax.random.uniform(ks[3], (2 * C,), jnp.float32,
                            -1.0 / math.sqrt(C * 3), 1.0 / math.sqrt(C * 3))
    wc = jax.random.normal(ks[4], (2 * C, n_mels, 1), jnp.float32) * math.sqrt(2.0 / n_mels)
    bc = jax.random.uniform(ks[5], (2 * C,), jnp.float32,
                            -1.0 / math.sqrt(n_mels), 1.0 / math.sqrt(n_mels))
    wo = jax.random.normal(ks[6], (2 * C, C, 1), jnp.float32) * math.sqrt(2.0 / C)
    bo = jax.random.uniform(ks[7], (2 * C,), jnp.float32,
                            -1.0 / math.sqrt(C), 1.0 / math.sqrt(C))
    return dict(wlin=wlin, blin=blin, wd=wd, bd=bd, wc=wc, bc=bc, wo=wo, bo=bo)


if __name__ == "__main__":
    key = jax.random.PRNGKey(0)

    # --- Config 1: tiny unaligned shapes (pad + aliased-copy path, no edge masks).
    B, C, L = 2, 4, 16
    n_mels, dim_base, dilation = 8, 32, 2
    k_x, k_d, k_c, k_p = jax.random.split(key, 4)
    x = jax.random.normal(k_x, (B, C, L), jnp.float32)
    diffusion_step = jax.random.normal(k_d, (B, dim_base), jnp.float32)
    conditioner = jax.random.normal(k_c, (B, n_mels, L), jnp.float32)
    lengths = jnp.array([L, L - 4])
    x_mask = (jnp.arange(L)[None, None, :] < lengths[:, None, None]).astype(jnp.float32)
    params = init_params(k_p, n_mels, C, dim_base)

    out_r, skip_r = residual_block_ref(x, diffusion_step, conditioner, x_mask,
                                       params, dilation)

    # f32 MXU-operand path: tight numerical check against the reference.
    out, skip = residual_block(x, diffusion_step, conditioner, x_mask, params,
                               dilation=dilation, compute_dtype=jnp.float32)
    jax.block_until_ready((out, skip))
    assert jnp.allclose(out, out_r, atol=1e-4, rtol=1e-4), "residual mismatch (f32)"
    assert jnp.allclose(skip, skip_r, atol=1e-4, rtol=1e-4), "skip mismatch (f32)"

    # bf16 MXU-operand / bf16-skip path (production config): loose check.
    out16, skip16 = residual_block(x, diffusion_step, conditioner, x_mask, params,
                                   dilation=dilation, compute_dtype=jnp.bfloat16)
    jax.block_until_ready((out16, skip16))
    assert jnp.allclose(out16, out_r, atol=1e-1, rtol=1e-1), "residual mismatch (bf16)"
    assert jnp.allclose(skip16.astype(jnp.float32), skip_r,
                        atol=1e-1, rtol=1e-1), "skip mismatch (bf16)"

    # --- Config 2: already (8,128)-aligned shapes -> no wrapper pad pass,
    # alias dropped, and the Lp < L + dilation edge-mask branch is exercised.
    B2, C2, L2 = 1, 8, 128
    n_mels2, dim_base2, dilation2 = 8, 16, 4
    k_x2, k_d2, k_c2, k_p2 = jax.random.split(jax.random.PRNGKey(1), 4)
    x2 = jax.random.normal(k_x2, (B2, C2, L2), jnp.float32)
    ds2 = jax.random.normal(k_d2, (B2, dim_base2), jnp.float32)
    c2 = jax.random.normal(k_c2, (B2, n_mels2, L2), jnp.float32)
    m2 = (jnp.arange(L2)[None, None, :] < 100).astype(jnp.float32)
    p2 = init_params(k_p2, n_mels2, C2, dim_base2)

    o2_ref, s2_ref = residual_block_ref(x2, ds2, c2, m2, p2, dilation2)
    o2, s2 = residual_block(x2, ds2, c2, m2, p2, dilation=dilation2,
                            compute_dtype=jnp.float32)
    jax.block_until_ready((o2, s2))
    assert jnp.allclose(o2, o2_ref, atol=1e-4, rtol=1e-4), "residual mismatch (aligned)"
    assert jnp.allclose(s2, s2_ref, atol=1e-4, rtol=1e-4), "skip mismatch (aligned)"

    print("KERNEL_OK")
</pallas_src>

<mosaic_0001>
module attributes {stable_mosaic.version = 11 : i64} {
  func.func @_residual_block_kernel(%arg0: i32, %arg1: memref<1x8x128xf32, #tpu.memory_space<vmem>>, %arg2: memref<1x8x1xf32, #tpu.memory_space<vmem>>, %arg3: memref<1x8x128xf32, #tpu.memory_space<vmem>>, %arg4: memref<1x1x128xf32, #tpu.memory_space<vmem>>, %arg5: memref<16x32xf32, #tpu.memory_space<vmem>>, %arg6: memref<16x8xf32, #tpu.memory_space<vmem>>, %arg7: memref<16x1xf32, #tpu.memory_space<vmem>>, %arg8: memref<16x1xf32, #tpu.memory_space<vmem>>, %arg9: memref<1x8x128xf32, #tpu.memory_space<vmem>>, %arg10: memref<1x8x128xf32, #tpu.memory_space<vmem>>) attributes {dimension_semantics = [#tpu.dimension_semantics<parallel>], iteration_bounds = array<i64: 2>, scalar_prefetch = 0 : i64, scratch_operands = 0 : i64, tpu.core_type = #tpu.core_type<tc>, window_params = [{transform_indices = @transform_0, window_bounds = array<i64: 1, 8, 128>}, {transform_indices = @transform_1, window_bounds = array<i64: 1, 8, 1>}, {transform_indices = @transform_2, window_bounds = array<i64: 1, 8, 128>}, {transform_indices = @transform_3, window_bounds = array<i64: 1, 1, 128>}, {pipeline_mode = #tpu.pipeline_mode<synchronous>, transform_indices = @transform_4, window_bounds = array<i64: 16, 32>}, {pipeline_mode = #tpu.pipeline_mode<synchronous>, transform_indices = @transform_5, window_bounds = array<i64: 16, 8>}, {pipeline_mode = #tpu.pipeline_mode<synchronous>, transform_indices = @transform_6, window_bounds = array<i64: 16, 1>}, {pipeline_mode = #tpu.pipeline_mode<synchronous>, transform_indices = @transform_7, window_bounds = array<i64: 16, 1>}, {transform_indices = @transform_8, window_bounds = array<i64: 1, 8, 128>}, {transform_indices = @transform_9, window_bounds = array<i64: 1, 8, 128>}]} {
    %c0 = arith.constant 0 : index
    %c0_0 = arith.constant 0 : index
    %c0_1 = arith.constant 0 : index
    %0 = vector.load %arg1[%c0, %c0_0, %c0_1] : memref<1x8x128xf32, #tpu.memory_space<vmem>>, vector<1x8x128xf32>
    %1 = vector.shape_cast %0 : vector<1x8x128xf32> to vector<8x128xf32>
    %c0_2 = arith.constant 0 : index
    %c0_3 = arith.constant 0 : index
    %c0_4 = arith.constant 0 : index
    %2 = vector.load %arg4[%c0_2, %c0_3, %c0_4] : memref<1x1x128xf32, #tpu.memory_space<vmem>>, vector<1x1x128xf32>
    %3 = vector.shape_cast %2 : vector<1x1x128xf32> to vector<1x128xf32>
    %c0_5 = arith.constant 0 : index
    %c0_6 = arith.constant 0 : index
    %c0_7 = arith.constant 0 : index
    %4 = vector.load %arg2[%c0_5, %c0_6, %c0_7] : memref<1x8x1xf32, #tpu.memory_space<vmem>>, vector<1x8x1xf32>
    %5 = vector.shape_cast %4 : vector<1x8x1xf32> to vector<8x1xf32>
    %6 = vector.broadcast %5 : vector<8x1xf32> to vector<8x128xf32>
    %7 = arith.addf %1, %6 : vector<8x128xf32>
    %8 = vector.broadcast %3 : vector<1x128xf32> to vector<8x128xf32>
    %9 = arith.mulf %7, %8 : vector<8x128xf32>
    %c2_i32 = arith.constant 2 : i32
    %10 = tpu.dynamic_rotate %9 by %c2_i32 dim 1 : vector<8x128xf32>, i32 -> vector<8x128xf32>
    %c126_i32 = arith.constant 126 : i32
    %11 = tpu.dynamic_rotate %9 by %c126_i32 dim 1 : vector<8x128xf32>, i32 -> vector<8x128xf32>
    %c0_8 = arith.constant 0 : index
    %c0_9 = arith.constant 0 : index
    %c0_10 = arith.constant 0 : index
    %12 = vector.load %arg3[%c0_8, %c0_9, %c0_10] : memref<1x8x128xf32, #tpu.memory_space<vmem>>, vector<1x8x128xf32>
    %13 = vector.shape_cast %12 : vector<1x8x128xf32> to vector<8x128xf32>
    %14 = tpu.concatenate %10, %9, %11, %13 in 0 : vector<8x128xf32>, vector<8x128xf32>, vector<8x128xf32>, vector<8x128xf32> -> vector<32x128xf32>
    %c0_11 = arith.constant 0 : index
    %c0_12 = arith.constant 0 : index
    %15 = vector.load %arg5[%c0_11, %c0_12] : memref<16x32xf32, #tpu.memory_space<vmem>>, vector<16x32xf32>
    %cst = arith.constant dense<0.000000e+00> : vector<16x128xf32>
    %16 = tpu.matmul %15, %14, %cst {dimension_numbers = #tpu.dot_dimension_numbers<[1], [0], [0], [1], [0, 0, 1, 1], [], []>} : vector<16x32xf32>, vector<32x128xf32>, vector<16x128xf32> -> vector<16x128xf32>
    %c0_13 = arith.constant 0 : index
    %c0_14 = arith.constant 0 : index
    %17 = vector.load %arg7[%c0_13, %c0_14] : memref<16x1xf32, #tpu.memory_space<vmem>>, vector<16x1xf32>
    %18 = vector.broadcast %17 : vector<16x1xf32> to vector<16x128xf32>
    %19 = arith.addf %16, %18 : vector<16x128xf32>
    %20 = vector.extract_strided_slice %19 {offsets = [0, 0], sizes = [8, 128], strides = [1, 1]} : vector<16x128xf32> to vector<8x128xf32>
    %21 = arith.negf %20 : vector<8x128xf32>
    %22 = math.exp %21 : vector<8x128xf32>
    %cst_15 = arith.constant 1.000000e+00 : f32
    %23 = vector.broadcast %cst_15 : f32 to vector<8x128xf32>
    %24 = arith.addf %23, %22 : vector<8x128xf32>
    %25 = arith.divf %23, %24 : vector<8x128xf32>
    %26 = vector.extract_strided_slice %19 {offsets = [8, 0], sizes = [8, 128], strides = [1, 1]} : vector<16x128xf32> to vector<8x128xf32>
    %27 = math.tanh %26 : vector<8x128xf32>
    %28 = arith.mulf %25, %27 : vector<8x128xf32>
    %c0_16 = arith.constant 0 : index
    %c0_17 = arith.constant 0 : index
    %29 = vector.load %arg6[%c0_16, %c0_17] : memref<16x8xf32, #tpu.memory_space<vmem>>, vector<16x8xf32>
    %30 = vector.broadcast %3 : vector<1x128xf32> to vector<8x128xf32>
    %31 = arith.mulf %28, %30 : vector<8x128xf32>
    %cst_18 = arith.constant dense<0.000000e+00> : vector<16x128xf32>
    %32 = tpu.matmul %29, %31, %cst_18 {dimension_numbers = #tpu.dot_dimension_numbers<[1], [0], [0], [1], [0, 0, 1, 1], [], []>} : vector<16x8xf32>, vector<8x128xf32>, vector<16x128xf32> -> vector<16x128xf32>
    %c0_19 = arith.constant 0 : index
    %c0_20 = arith.constant 0 : index
    %33 = vector.load %arg8[%c0_19, %c0_20] : memref<16x1xf32, #tpu.memory_space<vmem>>, vector<16x1xf32>
    %34 = vector.broadcast %33 : vector<16x1xf32> to vector<16x128xf32>
    %35 = arith.addf %32, %34 : vector<16x128xf32>
    %36 = vector.extract_strided_slice %35 {offsets = [0, 0], sizes = [8, 128], strides = [1, 1]} : vector<16x128xf32> to vector<8x128xf32>
    %37 = arith.addf %1, %36 : vector<8x128xf32>
    %cst_21 = arith.constant 0.707106769 : f32
    %38 = vector.broadcast %cst_21 : f32 to vector<8x128xf32>
    %39 = arith.mulf %37, %38 : vector<8x128xf32>
    %c0_22 = arith.constant 0 : index
    %c0_23 = arith.constant 0 : index
    %c0_24 = arith.constant 0 : index
    %40 = vector.load %arg9[%c0_22, %c0_23, %c0_24] : memref<1x8x128xf32, #tpu.memory_space<vmem>>, vector<1x8x128xf32>
    %41 = vector.shape_cast %40 : vector<1x8x128xf32> to vector<8x128xf32>
    %42 = vector.shape_cast %39 : vector<8x128xf32> to vector<1x8x128xf32>
    tpu.vector_store %arg9[%c0_22, %c0_23, %c0_24], %42 {strides = array<i32>} : memref<1x8x128xf32, #tpu.memory_space<vmem>>, vector<1x8x128xf32>,
    %43 = vector.extract_strided_slice %35 {offsets = [8, 0], sizes = [8, 128], strides = [1, 1]} : vector<16x128xf32> to vector<8x128xf32>
    %c0_25 = arith.constant 0 : index
    %c0_26 = arith.constant 0 : index
    %c0_27 = arith.constant 0 : index
    %44 = vector.load %arg10[%c0_25, %c0_26, %c0_27] : memref<1x8x128xf32, #tpu.memory_space<vmem>>, vector<1x8x128xf32>
    %45 = vector.shape_cast %44 : vector<1x8x128xf32> to vector<8x128xf32>
    %46 = vector.shape_cast %43 : vector<8x128xf32> to vector<1x8x128xf32>
    tpu.vector_store %arg10[%c0_25, %c0_26, %c0_27], %46 {strides = array<i32>} : memref<1x8x128xf32, #tpu.memory_space<vmem>>, vector<1x8x128xf32>,
    return
  }
  func.func @transform_0(%arg0: i32) -> (i32, i32, i32) {
    %c0_i32 = arith.constant 0 : i32
    %c0_i32_0 = arith.constant 0 : i32
    %c0_i32_1 = arith.constant 0 : i32
    return %arg0, %c0_i32, %c0_i32_0 : i32, i32, i32
  }
  func.func @transform_1(%arg0: i32) -> (i32, i32, i32) {
    %c0_i32 = arith.constant 0 : i32
    %c0_i32_0 = arith.constant 0 : i32
    %c0_i32_1 = arith.constant 0 : i32
    return %arg0, %c0_i32, %c0_i32_0 : i32, i32, i32
  }
  func.func @transform_2(%arg0: i32) -> (i32, i32, i32) {
    %c0_i32 = arith.constant 0 : i32
    %c0_i32_0 = arith.constant 0 : i32
    %c0_i32_1 = arith.constant 0 : i32
    return %arg0, %c0_i32, %c0_i32_0 : i32, i32, i32
  }
  func.func @transform_3(%arg0: i32) -> (i32, i32, i32) {
    %c0_i32 = arith.constant 0 : i32
    %c0_i32_0 = arith.constant 0 : i32
    %c0_i32_1 = arith.constant 0 : i32
    return %arg0, %c0_i32, %c0_i32_0 : i32, i32, i32
  }
  func.func @transform_4(%arg0: i32) -> (i32, i32) {
    %c0_i32 = arith.constant 0 : i32
    %c0_i32_0 = arith.constant 0 : i32
    %c0_i32_1 = arith.constant 0 : i32
    return %c0_i32, %c0_i32_0 : i32, i32
  }
  func.func @transform_5(%arg0: i32) -> (i32, i32) {
    %c0_i32 = arith.constant 0 : i32
    %c0_i32_0 = arith.constant 0 : i32
    %c0_i32_1 = arith.constant 0 : i32
    return %c0_i32, %c0_i32_0 : i32, i32
  }
  func.func @transform_6(%arg0: i32) -> (i32, i32) {
    %c0_i32 = arith.constant 0 : i32
    %c0_i32_0 = arith.constant 0 : i32
    %c0_i32_1 = arith.constant 0 : i32
    return %c0_i32, %c0_i32_0 : i32, i32
  }
  func.func @transform_7(%arg0: i32) -> (i32, i32) {
    %c0_i32 = arith.constant 0 : i32
    %c0_i32_0 = arith.constant 0 : i32
    %c0_i32_1 = arith.constant 0 : i32
    return %c0_i32, %c0_i32_0 : i32, i32
  }
  func.func @transform_8(%arg0: i32) -> (i32, i32, i32) {
    %c0_i32 = arith.constant 0 : i32
    %c0_i32_0 = arith.constant 0 : i32
    %c0_i32_1 = arith.constant 0 : i32
    return %arg0, %c0_i32, %c0_i32_0 : i32, i32, i32
  }
  func.func @transform_9(%arg0: i32) -> (i32, i32, i32) {
    %c0_i32 = arith.constant 0 : i32
    %c0_i32_0 = arith.constant 0 : i32
    %c0_i32_1 = arith.constant 0 : i32
    return %arg0, %c0_i32, %c0_i32_0 : i32, i32, i32
  }
}

</mosaic_0001>

<bundles_post_ra>
// kernel: residual_block.1
= control target key start
LH: loop header
LB: loop body
LE: loop exit
PB: predicated region body
PF: predicated region fallthrough
CT: control target
= control target key end

     0   :  { %s853_s30 = smov 0   ;;  %s917_s0 = inlined_call_operand.vmem [shape: f32[2,8,128], index: 0, kind: input, shape index: {}, may-alias: {0,8}]   ;;  %s918_s1 = inlined_call_operand.vmem [shape: f32[2,8,1], index: 1, kind: input, shape index: {}]   ;;  %s919_s2 = inlined_call_operand.vmem [shape: f32[2,8,128], index: 2, kind: input, shape index: {}]   ;;  %s920_s3 = inlined_call_operand.vmem [shape: f32[2,1,128], index: 3, kind: input, shape index: {}]   ;;  %s921_s4 = inlined_call_operand.vmem [shape: f32[16,32], index: 4, kind: input, shape index: {}]   ;;  %s922_s5 = inlined_call_operand.vmem [shape: f32[16,8], index: 5, kind: input, shape index: {}]   ;;  %s923_s6 = inlined_call_operand.vmem [shape: f32[16,1], index: 6, kind: input, shape index: {}]   ;;  %s924_s7 = inlined_call_operand.vmem [shape: f32[16,1], index: 7, kind: input, shape index: {}]   ;;  %s925_s8 = inlined_call_operand.vmem [shape: f32[2,8,128], index: 8, kind: output, shape index: {0}, may-alias: {0,8}]   ;;  %s926_s9 = inlined_call_operand.vmem [shape: f32[2,8,128], index: 9, kind: output, shape index: {1}]  }
   0x1 LB: > { %s730_s10 = sadd.s32 4294967295, %s798_s30   ;;  %p734_p0 = scmp.ge.s32.totalorder %s798_s30, 1  ;;  %s798_s30 = sphi %s853_s30, %s20_s30  }
   0x2   : > { %p315_p1 = scmp.lt.s32.totalorder %s798_s30, 3 }
   0x4   : > { %p316_p2 = pnand %p734_p0, %p315_p1 }
   0x5   : > { %p364_p3 = scmp.lt.s32.totalorder (!%p316_p2), %s730_s10, 1  ;;  %s801_s26 = smov (!%p316_p2), 2  }
   0x6   : > { %319 = sbr.rel (%p316_p2) target bundleno = 701 (0x2bd), region = 52  ;;  %s802_s27 = smov (!%p316_p2), 126  }
   0xb   : > { %v800_v0 = vmov 0   ;;  %s928_s10 = smov (!%p364_p3, %s730_s10), 1  ;;  %v408_v3 = vld [vmem:[%s921_s4] sm:$0xff]  ;;  %vm422_vm0 = vcmask 261120   ;;  %v411_v9 = vld [vmem:[%s923_s6 + $0x8] sm:$0xff]  ;;  %vm527_vm1 = vcmask 64512  }
   0xc   : > { %784 = vset.pattern.permute.xlu0 %v800_v0  ;;  %785 = vset.pattern.permute.xlu1 %v800_v0  ;;  %s861_s11 = sshll.u32 %s928_s10, 3  ;;  %s378_s25 = scalar_lea.vmem %s920_s3, %s928_s10  ;;  %v410_v10 = vld [vmem:[%s923_s6] sm:$0xff]  ;;  %v516_v11 = vld [vmem:[%s924_s7 + $0x8] sm:$0xff] }
   0xd   : > { %s371_s14 = scalar_lea.vmem %s918_s1, %s861_s11  ;;  %s375_s17 = scalar_lea.vmem %s919_s2, %s861_s11  ;;  %765 = vmatprep.mubr.msk.f32.mxu0 %vm422_vm0, %v408_v3  ;;  %v740_v5 = vld [vmem:[%s378_s25] ss:$0 sm:$0xff]  ;;  %v409_v15 = vld [vmem:[%s921_s4 + $0x8] sm:$0xff] }
   0xe   : > { %v389_v1 = vld [vmem:[%s371_s14] sm:$0xff]  ;;  %s367_s20 = scalar_lea.vmem %s917_s0, %s861_s11  ;;  %v513_v30 = vld [vmem:[%s922_s5 + $0x8] sm:$0xff]  ;;  %s386_s25 = scalar_lea.vmem %s926_s9, %s861_s11 }
   0xf   : > { %392 = vperm.xlu0 %784, %v389_v1   ;;  %v407_v2 = vld [vmem:[%s375_s17] sm:$0xff]  ;;  %s382_s28 = scalar_lea.vmem %s925_s8, %s861_s11 }
  0x10   : > { %757 = vmatprep.subr.mxu0 %v407_v2  ;;  %v387_v4 = vld [vmem:[%s367_s20] sm:$0xff] }
  0x11   : > { %758 = vmatpush3.msra.mxu0 %v407_v2  ;;  %v515_v12 = vld [vmem:[%s924_s7] sm:$0xff] }
  0x12   : > { %v512_v16 = vld [vmem:[%s922_s5] sm:$0xff] }
  0x13   : > { %770 = vmatprep.mubr.msk.f32.mxu1 %vm527_vm1, %v512_v16 }
  0x8a   : > { %v393_v6 = vpop.permute.xlu0 %392 }
  0x8b   : > { %v395_v7 = vadd.f32 %v393_v6, %v387_v4 }
  0x8d   : > { %v402_v8 = vmul.f32 %v740_v5, %v395_v7 }
  0x8f   : > { %403 = vrot.lane.b32.xlu1 %v402_v8, %s801_s26  ;;  %405 = vrot.lane.b32.xlu0 %v402_v8, %s802_s27 }
  0x93   : > { %419 = vperm.xlu0 %784, %v411_v9   ;;  %414 = vperm.xlu1 %785, %v410_v10  }
  0x97   : > { %524 = vperm.xlu0 %784, %v516_v11   ;;  %519 = vperm.xlu1 %785, %v515_v12  }
 0x101   : > { %v406_v13 = vpop.permute.xlu0 %405  ;;  %v404_v14 = vpop.permute.xlu1 %403 }
 0x102   : > { %759 = vmatprep.subr.mxu0 %v406_v13 }
 0x103   : > { %760 = vmatpush3.msra.mxu0 %v406_v13 }
 0x104   : > { %761 = vmatprep.subr.mxu0 %v402_v8 }
 0x105   : > { %762 = vmatpush3.msra.mxu0 %v402_v8 }
 0x106   : > { %763 = vmatprep.subr.mxu0 %v404_v14 }
 0x107   : > { %764 = vmatpush3.msra.mxu0 %v404_v14 }
 0x108   : > { %766 = vmatmul.mubr.msk.f32.vlgmr.msra.gmra.mxu0 %vm422_vm0, %v409_v15 }
 0x10e   : > { %v415_v18 = vpop.permute.xlu1 %414  ;;  %v420_v22 = vpop.permute.xlu0 %419 }
 0x112   : > { %v525_v31 = vpop.permute.xlu0 %524  ;;  %v520_v34 = vpop.permute.xlu1 %519 }
 0x1c8   : > { %v767_v17 = vpop.f32.mrf.mxu0 }
 0x1c9   : > { %v501_v23 = vadd.f32 %v767_v17, %v420_v22 }
 0x1ca   : > { %v495_v19 = vpop.f32.mrf.mxu0 }
 0x1cb   : > { %v496_v20 = vadd.f32 %v495_v19, %v415_v18 }
 0x1cd   : > { %v743_v21 = vmul.f32 -1.442695, %v496_v20 }
 0x1cf   : > { %786 = vpow2.f32 %v743_v21 }
 0x1d0   : > { %788 = vtanh.f32 %v501_v23 }
 0x1dc   : > { %v787_v24 = vpop.eup %786 }
 0x1dd   : > { %v507_v25 = vadd.f32 1.0, %v787_v24  ;;  %v789_v26 = vpop.eup %788 }
 0x1df   : > { %790 = vrcp.f32 %v507_v25 }
 0x1ec   : > { %v791_v27 = vpop.eup %790 }
 0x1ed   : > { %v511_v28 = vmul.f32 %v791_v27, %v789_v26 }
 0x1ef   : > { %v514_v29 = vmul.f32 %v740_v5, %v511_v28 }
 0x1f1   : > { %768 = vmatprep.subr.mxu1 %v514_v29 }
 0x1f2   : > { %769 = vmatpush3.msra.mxu1 %v514_v29 }
 0x1f3   : > { %771 = vmatmul.mubr.msk.f32.vlgmr.msra.gmra.mxu1 %vm527_vm1, %v513_v30 }
 0x2b3   : > { %v772_v32 = vpop.f32.mrf.mxu1 }
 0x2b4   : > { %v606_v33 = vadd.f32 %v772_v32, %v525_v31 }
 0x2b5   : > { %v600_v35 = vpop.f32.mrf.mxu1 }
 0x2b6   : > { %612 = vst [vmem:[%s386_s25] sm:$0xff] %v606_v33  ;;  %v601_v36 = vadd.f32 %v600_v35, %v520_v34 }
 0x2b8   : > { %v609_v37 = vadd.f32 %v601_v36, %v387_v4 }
 0x2ba   : > { %v610_v38 = vmul.f32 0.70710677, %v609_v37 }
 0x2bc   : > { %611 = vst [vmem:[%s382_s28] sm:$0xff] %v610_v38 }
 0x2bd PF: > { %s20_s30 = sadd.s32 1, %s798_s30  }
 0x2be   : > { %p17_p4 = scmp.ge.s32.totalorder %s20_s30, 4  }
 0x2c0   :  { %19 = sbr.rel (!%p17_p4) target bundleno = 1 (0x1), region = 103 }

</bundles_post_ra>
